<compile_context>
chip_gen: v5e
topology: v5e:2x2
jax: 0.10.0
libtpu: 0.0.40
codegen_flags: <defaults>
</compile_context>

<pallas_src>
import functools

import jax
import jax.numpy as jnp
from jax.experimental import pallas as pl
from jax.experimental.pallas import tpu as pltpu


def _attention_kernel(x_ref, wqkv_ref, wout_ref, bout_ref, o_ref, *, heads):
    # x_ref:    (1, N, D)    one batch element
    # wqkv_ref: (D, 3D)      fused QKV right-multiply weight, columns head-major
    #                        [q(scaled) | k | v] groups of width d per head
    # wout_ref: (D, D)       output projection, right-multiply layout (w_out.T)
    # bout_ref: (1, D)
    # o_ref:    (1, N, D)
    _, N, D = x_ref.shape
    d = D // heads

    x = x_ref[0]                                                  # (N, D)

    # --- single fused QKV projection: one MXU chain, 3D output lanes -------
    qkv = jnp.dot(x, wqkv_ref[...],
                  preferred_element_type=jnp.float32)             # (N, 3D)

    # One relayout to head-major (XLU; slack slot), then static lane slices.
    qkvh = jnp.transpose(qkv.reshape(N, heads, 3 * d), (1, 0, 2))  # (H, N, 3d)
    q = qkvh[..., :d]                                              # (H, N, d), pre-scaled
    k = qkvh[..., d:2 * d]                                         # (H, N, d)
    v = qkvh[..., 2 * d:]                                          # (H, N, d)

    # --- scores + numerically stable softmax (f32) --------------------------
    dots = jnp.einsum('hnd,hmd->hnm', q, k,
                      preferred_element_type=jnp.float32)          # (H, N, N)
    dots = dots - jnp.max(dots, axis=-1, keepdims=True)
    e = jnp.exp(dots)
    attn = e * pl.reciprocal(jnp.sum(e, axis=-1, keepdims=True), approx=True)

    # --- attention-weighted values ------------------------------------------
    out = jnp.einsum('hnm,hmd->hnd', attn, v,
                     preferred_element_type=jnp.float32)           # (H, N, d)

    # --- head merge + output projection fused into one K=D matmul ----------
    out2d = jnp.transpose(out, (1, 0, 2)).reshape(N, D)            # (N, D) = b n (h d)
    y = jnp.dot(out2d, wout_ref[...],
                preferred_element_type=jnp.float32) + bout_ref[0]  # (N, D)

    o_ref[0] = y.astype(o_ref.dtype)


def attention_forward(x, w_qkv, w_out, b_out, *, heads):
    """x: (B, N, D).  w_qkv: (3D, D) torch layout.  w_out: (D, D).  b_out: (D,)."""
    B, N, D = x.shape
    assert D % heads == 0
    d = D // heads
    scale = D ** (-0.5)   # PyTorch module scales by dim**-0.5 (not head_dim**-0.5)

    # ---- wrapper-side (XLA) weight re-layout ----
    # Fused QKV weight: (D, 3D), columns head-major interleaved [q | k | v]
    # groups of width d per head, with the softmax scale folded into q.
    w_qkv = jnp.asarray(w_qkv)
    wq, wk, wv = jnp.split(w_qkv, 3, axis=0)          # each (D, D), (out, in)
    wq = wq * scale
    fused = jnp.concatenate(
        [wq.reshape(heads, d, D),
         wk.reshape(heads, d, D),
         wv.reshape(heads, d, D)], axis=1)             # (H, 3d, D)
    w_qkv_fused = fused.reshape(3 * D, D).T            # (D, 3D)

    w_out_t = jnp.asarray(w_out).T                     # (D, D), right-multiply
    b_out_2d = jnp.asarray(b_out)[None, :]             # (1, D)

    kernel = functools.partial(_attention_kernel, heads=heads)

    # Grid-invariant params: single-buffered (no point double-buffering them).
    const2 = lambda b: (0, 0)
    single = pl.Buffered(1)

    return pl.pallas_call(
        kernel,
        out_shape=jax.ShapeDtypeStruct((B, N, D), x.dtype),
        grid_spec=pltpu.PrefetchScalarGridSpec(
            num_scalar_prefetch=0,
            grid=(B,),
            in_specs=[
                pl.BlockSpec((1, N, D), lambda b: (b, 0, 0)),
                pl.BlockSpec((D, 3 * D), const2, pipeline_mode=single),
                pl.BlockSpec((D, D), const2, pipeline_mode=single),
                pl.BlockSpec((1, D), const2, pipeline_mode=single),
            ],
            out_specs=pl.BlockSpec((1, N, D), lambda b: (b, 0, 0)),
        ),
        compiler_params=pltpu.CompilerParams(
            dimension_semantics=("parallel",)),   # v7x: batch shards across both TCs
    )(x, w_qkv_fused, w_out_t, b_out_2d)


def _reference(x, w_qkv, w_out, b_out, *, heads):
    """Pure-JAX reference mirroring the PyTorch forward (mask=None)."""
    B, N, D = x.shape
    d = D // heads
    scale = D ** (-0.5)
    qkv = x @ w_qkv.T                                       # (B, N, 3D)
    q, k, v = jnp.split(qkv, 3, axis=-1)

    def split_heads(t):                                     # b n (h d) -> b h n d
        return t.reshape(B, N, heads, d).transpose(0, 2, 1, 3)

    q, k, v = map(split_heads, (q, k, v))
    dots = jnp.einsum('bhid,bhjd->bhij', q, k) * scale
    attn = jax.nn.softmax(dots, axis=-1)
    out = jnp.einsum('bhij,bhjd->bhid', attn, v)
    out = out.transpose(0, 2, 1, 3).reshape(B, N, D)        # b h n d -> b n (h d)
    return out @ w_out.T + b_out


if __name__ == "__main__":
    B, N, D, HEADS = 2, 8, 32, 8

    key = jax.random.PRNGKey(0)
    k_x, k_qkv, k_wo, k_bo = jax.random.split(key, 4)

    x = jax.random.normal(k_x, (B, N, D), dtype=jnp.float32)
    # nn.Linear layout: (out_features, in_features)
    w_qkv = jax.random.normal(k_qkv, (3 * D, D), dtype=jnp.float32) * (1.0 / D ** 0.5)
    w_out = jax.random.normal(k_wo, (D, D), dtype=jnp.float32) * (1.0 / D ** 0.5)
    b_out = jax.random.normal(k_bo, (D,), dtype=jnp.float32) * 0.01

    y = attention_forward(x, w_qkv, w_out, b_out, heads=HEADS)
    y = jax.block_until_ready(y)

    y_ref = _reference(x, w_qkv, w_out, b_out, heads=HEADS)
    # Tolerance accommodates the approximate EUP reciprocal in the softmax and
    # the scale-folding rounding-order difference.
    assert jnp.allclose(y, y_ref, atol=2e-3, rtol=2e-3), "mismatch vs reference"

    print("KERNEL_OK")
</pallas_src>

<mosaic_0001>
module attributes {stable_mosaic.version = 11 : i64} {
  func.func @_attention_kernel(%arg0: i32, %arg1: memref<1x8x32xf32, #tpu.memory_space<vmem>>, %arg2: memref<32x96xf32, #tpu.memory_space<vmem>>, %arg3: memref<32x32xf32, #tpu.memory_space<vmem>>, %arg4: memref<1x32xf32, #tpu.memory_space<vmem>>, %arg5: memref<1x8x32xf32, #tpu.memory_space<vmem>>) attributes {dimension_semantics = [#tpu.dimension_semantics<parallel>], iteration_bounds = array<i64: 2>, scalar_prefetch = 0 : i64, scratch_operands = 0 : i64, tpu.core_type = #tpu.core_type<tc>, window_params = [{transform_indices = @transform_0, window_bounds = array<i64: 1, 8, 32>}, {pipeline_mode = #tpu.pipeline_mode<synchronous>, transform_indices = @transform_1, window_bounds = array<i64: 32, 96>}, {pipeline_mode = #tpu.pipeline_mode<synchronous>, transform_indices = @transform_2, window_bounds = array<i64: 32, 32>}, {pipeline_mode = #tpu.pipeline_mode<synchronous>, transform_indices = @transform_3, window_bounds = array<i64: 1, 32>}, {transform_indices = @transform_4, window_bounds = array<i64: 1, 8, 32>}]} {
    %c0 = arith.constant 0 : index
    %c0_0 = arith.constant 0 : index
    %c0_1 = arith.constant 0 : index
    %0 = vector.load %arg1[%c0, %c0_0, %c0_1] : memref<1x8x32xf32, #tpu.memory_space<vmem>>, vector<1x8x32xf32>
    %1 = vector.shape_cast %0 : vector<1x8x32xf32> to vector<8x32xf32>
    %c0_2 = arith.constant 0 : index
    %c0_3 = arith.constant 0 : index
    %2 = vector.load %arg2[%c0_2, %c0_3] : memref<32x96xf32, #tpu.memory_space<vmem>>, vector<32x96xf32>
    %cst = arith.constant dense<0.000000e+00> : vector<8x96xf32>
    %3 = tpu.matmul %1, %2, %cst {dimension_numbers = #tpu.dot_dimension_numbers<[1], [0], [0], [1], [0, 0, 1, 1], [], []>} : vector<8x32xf32>, vector<32x96xf32>, vector<8x96xf32> -> vector<8x96xf32>
    %4 = vector.shape_cast %3 : vector<8x96xf32> to vector<8x8x12xf32>
    %5 = tpu.transpose %4, [1, 0, 2] : vector<8x8x12xf32> -> vector<8x8x12xf32>
    %6 = vector.extract_strided_slice %5 {offsets = [0, 0, 0], sizes = [8, 8, 4], strides = [1, 1, 1]} : vector<8x8x12xf32> to vector<8x8x4xf32>
    %7 = vector.extract_strided_slice %5 {offsets = [0, 0, 4], sizes = [8, 8, 4], strides = [1, 1, 1]} : vector<8x8x12xf32> to vector<8x8x4xf32>
    %8 = vector.extract_strided_slice %5 {offsets = [0, 0, 8], sizes = [8, 8, 4], strides = [1, 1, 1]} : vector<8x8x12xf32> to vector<8x8x4xf32>
    "tpu.trace_start"() <{level = 10 : i32, message = "hnd,hmd->hnm"}> : () -> ()
    %cst_4 = arith.constant dense<0.000000e+00> : vector<8x8x8xf32>
    %9 = tpu.matmul %6, %7, %cst_4 {dimension_numbers = #tpu.dot_dimension_numbers<[2], [2], [1], [1], [0, 0, 0, 1, 1, 1], [0], [0]>} : vector<8x8x4xf32>, vector<8x8x4xf32>, vector<8x8x8xf32> -> vector<8x8x8xf32>
    "tpu.trace_stop"() : () -> ()
    %cst_5 = arith.constant dense<0xFF800000> : vector<8x8xf32>
    %10 = vector.multi_reduction <maximumf>, %9, %cst_5 [2] : vector<8x8x8xf32> to vector<8x8xf32>
    %11 = vector.shape_cast %10 : vector<8x8xf32> to vector<8x8x1xf32>
    %12 = vector.broadcast %11 : vector<8x8x1xf32> to vector<8x8x8xf32>
    %13 = arith.subf %9, %12 : vector<8x8x8xf32>
    %14 = math.exp %13 : vector<8x8x8xf32>
    %cst_6 = arith.constant dense<0.000000e+00> : vector<8x8xf32>
    %15 = vector.multi_reduction <add>, %14, %cst_6 [2] : vector<8x8x8xf32> to vector<8x8xf32>
    %16 = vector.shape_cast %15 : vector<8x8xf32> to vector<8x8x1xf32>
    %17 = tpu.reciprocal %16 {approx = true} : vector<8x8x1xf32> -> vector<8x8x1xf32>
    %18 = vector.broadcast %17 : vector<8x8x1xf32> to vector<8x8x8xf32>
    %19 = arith.mulf %14, %18 : vector<8x8x8xf32>
    "tpu.trace_start"() <{level = 10 : i32, message = "hnm,hmd->hnd"}> : () -> ()
    %cst_7 = arith.constant dense<0.000000e+00> : vector<8x8x4xf32>
    %20 = tpu.matmul %19, %8, %cst_7 {dimension_numbers = #tpu.dot_dimension_numbers<[2], [1], [1], [2], [0, 0, 0, 1, 1, 2], [0], [0]>} : vector<8x8x8xf32>, vector<8x8x4xf32>, vector<8x8x4xf32> -> vector<8x8x4xf32>
    "tpu.trace_stop"() : () -> ()
    %21 = tpu.transpose %20, [1, 0, 2] : vector<8x8x4xf32> -> vector<8x8x4xf32>
    %22 = vector.shape_cast %21 : vector<8x8x4xf32> to vector<8x32xf32>
    %c0_8 = arith.constant 0 : index
    %c0_9 = arith.constant 0 : index
    %23 = vector.load %arg3[%c0_8, %c0_9] : memref<32x32xf32, #tpu.memory_space<vmem>>, vector<32x32xf32>
    %cst_10 = arith.constant dense<0.000000e+00> : vector<8x32xf32>
    %24 = tpu.matmul %22, %23, %cst_10 {dimension_numbers = #tpu.dot_dimension_numbers<[1], [0], [0], [1], [0, 0, 1, 1], [], []>} : vector<8x32xf32>, vector<32x32xf32>, vector<8x32xf32> -> vector<8x32xf32>
    %c0_11 = arith.constant 0 : index
    %c0_12 = arith.constant 0 : index
    %25 = vector.load %arg4[%c0_11, %c0_12] : memref<1x32xf32, #tpu.memory_space<vmem>>, vector<1x32xf32>
    %26 = vector.shape_cast %25 : vector<1x32xf32> to vector<32xf32>
    %27 = vector.shape_cast %26 : vector<32xf32> to vector<1x32xf32>
    %28 = vector.broadcast %27 : vector<1x32xf32> to vector<8x32xf32>
    %29 = arith.addf %24, %28 : vector<8x32xf32>
    %c0_13 = arith.constant 0 : index
    %c0_14 = arith.constant 0 : index
    %c0_15 = arith.constant 0 : index
    %30 = vector.load %arg5[%c0_13, %c0_14, %c0_15] : memref<1x8x32xf32, #tpu.memory_space<vmem>>, vector<1x8x32xf32>
    %31 = vector.shape_cast %30 : vector<1x8x32xf32> to vector<8x32xf32>
    %32 = vector.shape_cast %29 : vector<8x32xf32> to vector<1x8x32xf32>
    tpu.vector_store %arg5[%c0_13, %c0_14, %c0_15], %32 {strides = array<i32>} : memref<1x8x32xf32, #tpu.memory_space<vmem>>, vector<1x8x32xf32>,
    return
  }
  func.func @transform_0(%arg0: i32) -> (i32, i32, i32) {
    %c0_i32 = arith.constant 0 : i32
    %c0_i32_0 = arith.constant 0 : i32
    %c0_i32_1 = arith.constant 0 : i32
    return %arg0, %c0_i32, %c0_i32_0 : i32, i32, i32
  }
  func.func @transform_1(%arg0: i32) -> (i32, i32) {
    %c0_i32 = arith.constant 0 : i32
    %c0_i32_0 = arith.constant 0 : i32
    %c0_i32_1 = arith.constant 0 : i32
    return %c0_i32, %c0_i32_0 : i32, i32
  }
  func.func @transform_2(%arg0: i32) -> (i32, i32) {
    %c0_i32 = arith.constant 0 : i32
    %c0_i32_0 = arith.constant 0 : i32
    %c0_i32_1 = arith.constant 0 : i32
    return %c0_i32, %c0_i32_0 : i32, i32
  }
  func.func @transform_3(%arg0: i32) -> (i32, i32) {
    %c0_i32 = arith.constant 0 : i32
    %c0_i32_0 = arith.constant 0 : i32
    %c0_i32_1 = arith.constant 0 : i32
    return %c0_i32, %c0_i32_0 : i32, i32
  }
  func.func @transform_4(%arg0: i32) -> (i32, i32, i32) {
    %c0_i32 = arith.constant 0 : i32
    %c0_i32_0 = arith.constant 0 : i32
    %c0_i32_1 = arith.constant 0 : i32
    return %arg0, %c0_i32, %c0_i32_0 : i32, i32, i32
  }
}

</mosaic_0001>

<bundles_post_ra>
// kernel: tpu_custom_call.1
= control target key start
LH: loop header
LB: loop body
LE: loop exit
PB: predicated region body
PF: predicated region fallthrough
CT: control target
= control target key end

     0   :  { %9 = vsyncpa [#allocation3], 0  ;;  %s2251_s0 = inlined_call_operand.hbm [shape: f32[2,8,32], index: 0, kind: input, shape index: {}]   ;;  %s2252_s1 = inlined_call_operand.hbm [shape: f32[32,96], index: 1, kind: input, shape index: {}]   ;;  %s2253_s2 = inlined_call_operand.hbm [shape: f32[32,32], index: 2, kind: input, shape index: {}]   ;;  %s2254_s3 = inlined_call_operand.vmem [shape: f32[1,32], index: 3, kind: input, shape index: {}]   ;;  %s2255_s4 = inlined_call_operand.hbm [shape: f32[2,8,32], index: 4, kind: output, shape index: {}]  }
   0x1   :  { %11 = vsyncpa [#allocation3 + $0x1], 0 }
   0x2   :  { %12 = vsyncpa [#allocation6], 0 }
   0x3   :  { %13 = vsyncpa [#allocation4], 0 }
   0x4   :  { %15 = vsyncpa [#allocation4 + $0x1], 0  ;;  %s1830_s15 = smov 0   ;;  %s1832_s16 = smov 0  }
   0x5   :  { %s1834_s17 = smov 0   ;;  %s1836_s18 = smov 0  }
   0x6 LB: > { %s152_s21 = sshll.u32 %s2252_s1, 4  ;;  %s1854_s22 = sadd.s32 4294967295, %s1781_s18   ;;  %s1781_s18 = sphi %s1836_s18, %s2266_s18   ;;  %s1777_s17 = sphi %s1834_s17, %s2265_s17   ;;  %s1773_s16 = sphi %s1832_s16, %s2264_s16   ;;  %s1769_s15 = sphi %s1830_s15, %s2263_s15   ;;  %s153_s21 = int_to_ptr.hbm [resolvable:$true] %s152_s21 }
   0x7   : > { %p1440_p0 = scmp.ge.s32.totalorder %s1781_s18, 1  ;;  %p42_p1 = scmp.eq.s32.totalorder %s1854_s22, 0 }
   0x8   : > { %p141_p2 = scmp.lt.s32.totalorder %s1781_s18, 3  ;;  %s1783_s24 = smov [#allocation5]  }
   0x9   : > { %s154_s25 = sshll.u32 %s1783_s24, 4  ;;  %s166_s28 = sshll.u32 %s2253_s2, 4  ;;  %s155_s25 = int_to_ptr.vmem [resolvable:$true] %s154_s25  ;;  %s167_s28 = int_to_ptr.hbm [resolvable:$true] %s166_s28 }
   0xa   : > { %p1859_p3 = pnand %p1440_p0, %p141_p2  ;;  %s1784_s29 = smov [#allocation7]  }
   0xb   : > { %s168_s30 = sshll.u32 %s1784_s29, 4  ;;  %s1785_s5 = smov 128   ;;  %s169_s30 = int_to_ptr.vmem [resolvable:$true] %s168_s30 }
   0xc   : > { %p1493_p4 = pneg %p1859_p3  ;;  %s1786_s6 = smov 8  }
   0xd   : > { %s1439_s7 = sadd.s32 4294967294, %s1781_s18   ;;  %s1873_s8 = sadd.s32 1, %s1781_s18  }
   0xe   : > { %p1494_p6 = pnand %p1493_p4, %p42_p1  ;;  %s25_s9 = ssub.s32 %s1781_s18, %s1873_s8 }
   0xf   : > { %s28_s10 = sadd.s32 1, %s1777_s17  ;;  %p26_p7 = scmp.eq.s32.totalorder %s25_s9, 0 }
  0x10   : > { %1496 = dma.hbm_to_vmem [thread:$0]  (!%p1494_p6), %s153_s21, 512, %s155_s25, [#allocation6], %s1785_s5, %s1785_s5, %s1786_s6  }
  0x11   : > { %1499 = dma.hbm_to_vmem [thread:$0]  (!%p1494_p6), %s167_s28, 512, %s169_s30, [#allocation6], %s1785_s5, %s1785_s5, %s1786_s6  }
  0x12   : > { %p35_p8 = scmp.ne.s32.totalorder %s1777_s17, %s1773_s16  ;;  %p36_p9 = scmp.eq.s32.totalorder %s1781_s18, 0 }
  0x13   : > { %p41_p10 = scmp.ne.s32.totalorder %s1773_s16, %s1769_s15  ;;  %p128_p13 = scmp.eq.s32.totalorder %s1854_s22, 1 }
  0x14   : > { %s1884_s11 = scalar_select %p26_p7, %s1777_s17, %s28_s10  }
  0x15   : > { %p1886_p11 = por %p36_p9, %p35_p8  ;;  %p1892_p12 = por %p42_p1, %p41_p10 }
  0x16   : > { %p134_p0 = scmp.eq.s32.totalorder %s1439_s7, 1  ;;  %p1510_p2 = scmp.lt.s32.totalorder %s1781_s18, 2 }
  0x17   : > { %s185_s14 = sand.u32 1, %s1777_s17   ;;  %p1899_p4 = por %p128_p13, %p35_p8 }
  0x18   : > { %p1903_p6 = por %p134_p0, %p41_p10  ;;  %s1444_s21 = sshll.u32 %s185_s14, 3 }
  0x19   : > { %s1445_s24 = sshll.u32 %s1781_s18, 3  ;;  %s189_s28 = scalar_lea.vmem [#allocation2], %s1444_s21 }
  0x1a   : > { %s193_s27 = scalar_lea.hbm %s2251_s0, %s1445_s24  ;;  %s197_s29 = sshll.u32 %s189_s28, 4  ;;  %s198_s29 = int_to_ptr.vmem [resolvable:$true] %s197_s29 }
  0x1b   : > { %s195_s30 = sshll.u32 %s193_s27, 4  ;;  %p1913_p7 = pnand %p1510_p2, %p1886_p11  ;;  %s196_s30 = int_to_ptr.hbm [resolvable:$true] %s195_s30 }
  0x1c   : > { %s186_s6 = scalar_lea.sflag [#allocation3], %s185_s14  ;;  %s1681_s7 = sshra.s32 %s196_s30, 4  ;;  %s1682_s7 = int_to_ptr.hbm [resolvable:$true] %s1681_s7 }
  0x1d   : > { %s1683_s9 = scalar_lea.hbm %s1682_s7, 8  ;;  %p1685_p9 = pneg %p1913_p7 }
  0x1e   : > { %p1684_p8 = scmp.ne.s32.totalorder %s1682_s7, %s1683_s9  ;;  %s1688_s24 = scalar_lea.hbm %s2251_s0, 16 }
  0x1f   : > { %p1689_p11 = scmp.lt.s32.totalorder %s1682_s7, %s2251_s0  ;;  %p1690_p0 = scmp.lt.s32.totalorder %s1688_s24, %s1683_s9 }
  0x20   : > { %p1686_p10 = pnand %p1685_p9, %p1684_p8 }
  0x21   : > { %p1691_p2 = por %p1690_p0, %p1689_p11 }
  0x22   : > { %p1687_p13 = pneg %p1686_p10 }
  0x24   : > { %p1692_p5 = pnand %p1691_p2, %p1687_p13 }
  0x26   : > { %1695 = shalt.err (!%p1692_p5)
}
  0x27   : > { %1503 = dma.hbm_to_vmem [thread:$0]  (!%p1913_p7), %s196_s30, 128, %s198_s29, %s186_s6  }
  0x28   : > { %206 = sbr.rel (%p1859_p3) target bundleno = 1325 (0x52d), region = 36  ;;  %s1930_s14 = sand.u32 (!%p1859_p3), 1, %s1773_s16  }
  0x29   : > { %s1447_s26 = sshll.u32 (!%p1859_p3), %s1930_s14, 3  ;;  %s209_s27 = scalar_lea.sflag (!%p1859_p3), [#allocation3], %s1930_s14 }
  0x2a   : > { %s212_s28 = scalar_lea.vmem (!%p1859_p3), [#allocation2], %s1447_s26 }
  0x2d   : > { %1756 = dma.done.wait (%p1892_p12), %s209_s27, 128  }
  0x2e   : > { %1758 = vsyncadd (%p1892_p12), %s209_s27, 4294967168 }
  0x2f   : > { %1760 = dma.done.wait (%p42_p1), [#allocation6], 1024  }
  0x30   : > { %1762 = vsyncadd (%p42_p1), [#allocation6], 4294966272  ;;  %v252_v0 = vld [vmem:[#allocation5 + $0x18] sm:$0xff]  ;;  %v251_v1 = vld [vmem:[#allocation5 + $0x10] sm:$0xff]  ;;  %vm253_vm0 = vcmask 261120   ;;  %s1787_s23 = smov 116  }
  0x31   : > { %269 = vmatpush.msra.mxu0 %v252_v0  ;;  %v250_v2 = vld [vmem:[#allocation5 + $0x8] sm:$0xff]  ;;  %v249_v3 = vld [vmem:[#allocation5] sm:$0xff]  ;;  %v248_v4 = vld [vmem:[%s212_s28] sm:$0xff]  ;;  %s1788_s13 = smov 80   ;;  %s1789_s29 = smov 104   ;;  %vm300_vm1 = vcmask 1047556  }
  0x32   : > { %s1790_s30 = smov 68   ;;  %s1791_s5 = smov 56   ;;  %v1794_v7 = vmov 1983009808   ;;  %v1795_v20 = vmov 1934713408  }
  0x33   : > { %270 = vmatpush.msra.mxu0 %v251_v1  ;;  %s1792_s6 = smov 92   ;;  %s1793_s7 = smov 44   ;;  %v305_v8 = vunpack.c.l.s4 %v1794_v7  ;;  %v353_v21 = vunpack.c.l.s4 %v1795_v20  ;;  %vm527_vm2 = vcmask 31744   ;;  %vm741_vm3 = vcmask 64512  }
  0x34   : > { %s1796_s9 = smov 124   ;;  %s1797_s10 = smov 120   ;;  %vm1292_vm4 = vcmask 97280   ;;  %vm1294_vm5 = vcmask 130048   ;;  %vm1296_vm6 = vcmask 162816   ;;  %vm1298_vm7 = vcmask 195584  }
  0x35   : > { %271 = vmatpush.msra.mxu0 %v250_v2  ;;  %v1945_v13 = vunpack.c.0.s8 %v305_v8  ;;  %v1957_v36 = vunpack.c.0.s8 %v353_v21  ;;  %s1798_s21 = smov 24   ;;  %s1799_s24 = smov 16   ;;  %vm1300_vm8 = vcmask 228352  }
  0x36   : > { %s1800_s25 = smov 4   ;;  %s1801_s12 = smov 8  }
  0x37   : > { %272 = vmatpush.msra.mxu0 %v249_v3  ;;  %s1802_s27 = smov 12   ;;  %s1803_s28 = smov 28  }
  0x38   : > { %1451 = vmatmul.msk.f32.vlgmr.msra.gmra.mxu0 %vm253_vm0, %v248_v4 }
  0xb5   : > { %v274_v5 = vpop.f32.mrf.mxu0 }
  0xb6   : > { %278 = vrot.lane.b32.xlu2 %v274_v5, %s1787_s23  ;;  %287 = vrot.lane.b32.xlu1 %v274_v5, %s1788_s13  ;;  %v302_v12 = vrot.slane %v274_v5, 4  ;;  %s1804_s23 = smov 20   ;;  %s1478_s13 = sshll.u32 %s1854_s22, 3 }
  0xb7   : > { %281 = vrot.lane.b32.xlu0 %v274_v5, %s1789_s29  ;;  %s1335_s22 = scalar_lea.sflag [#allocation4], %s1930_s14 }
  0xbe   : > { %290 = vrot.lane.b32.xlu2 %v274_v5, %s1790_s30  ;;  %293 = vrot.lane.b32.xlu1 %v274_v5, %s1791_s5  ;;  %s1345_s5 = scalar_lea.hbm %s2255_s4, %s1478_s13 }
  0xbf   : > { %284 = vrot.lane.b32.xlu0 %v274_v5, %s1792_s6 }
  0xc7   : > { %296 = vrot.lane.b32.xlu0 %v274_v5, %s1793_s7 }
 0x110   : > { %v279_v11 = vpop.permute.xlu2 %278 }
 0x111   : > { %v314_v16 = vrot.slane %v279_v11, 4 }
 0x118   : > { %v291_v33 = vpop.permute.xlu2 %290 }
 0x119   : > { %v338_v41 = vrot.slane %v291_v33, 4 }
 0x128   : > { %v288_v6 = vpop.permute.xlu1 %287 }
 0x129   : > { %v282_v9 = vpop.permute.xlu0 %281  ;;  %v326_v18 = vrot.slane %v288_v6, 4 }
 0x12a   : > { %v299_v10 = vrot.slane %v282_v9, 4  ;;  %v303_v14 = vsel %vm300_vm1, %v282_v9, %v302_v12 }
 0x12b   : > { %v311_v19 = vperm.slane %v303_v14, %v1945_v13 }
 0x12c   : > { %v301_v15 = vsel %vm300_vm1, %v299_v10, %v274_v5 }
 0x12d   : > { %v307_v23 = vperm.slane %v301_v15, %v1945_v13  ;;  %v362_v30 = vrot.slane %v311_v19, 4 }
 0x12f   : > { %v350_v34 = vrot.slane %v307_v23, 4 }
 0x130   : > { %v294_v17 = vpop.permute.xlu1 %293 }
 0x131   : > { %v285_v22 = vpop.permute.xlu0 %284  ;;  %v324_v24 = vrot.slane %v294_v17, 4  ;;  %v327_v28 = vsel %vm300_vm1, %v294_v17, %v326_v18 }
 0x132   : > { %v312_v25 = vrot.slane %v285_v22, 4  ;;  %v315_v26 = vsel %vm300_vm1, %v285_v22, %v314_v16  ;;  %v335_v37 = vperm.slane %v327_v28, %v1945_v13 }
 0x133   : > { %v323_v27 = vperm.slane %v315_v26, %v1945_v13  ;;  %v325_v35 = vsel %vm300_vm1, %v324_v24, %v288_v6 }
 0x134   : > { %v313_v29 = vsel %vm300_vm1, %v312_v25, %v279_v11  ;;  %v331_v42 = vperm.slane %v325_v35, %v1945_v13  ;;  %v386_v48 = vrot.slane %v335_v37, 4 }
 0x135   : > { %v319_v31 = vperm.slane %v313_v29, %v1945_v13  ;;  %v360_v32 = vrot.slane %v323_v27, 4  ;;  %v363_v39 = vsel %vm300_vm1, %v323_v27, %v362_v30 }
 0x136   : > { %v371_v46 = vperm.slane %v363_v39, %v1957_v36  ;;  %v374_v55 = vrot.slane %v331_v42, 4 }
 0x137   : > { %v348_v38 = vrot.slane %v319_v31, 4  ;;  %v351_v40 = vsel %vm300_vm1, %v319_v31, %v350_v34  ;;  %v361_v44 = vsel %vm300_vm1, %v360_v32, %v311_v19 }
 0x138   : > { %v359_v49 = vperm.slane %v351_v40, %v1957_v36  ;;  %v367_v52 = vperm.slane %v361_v44, %v1957_v36  ;;  %v410_v57 = vrot.slane %v371_v46, 4 }
 0x139   : > { %v349_v43 = vsel %vm300_vm1, %v348_v38, %v307_v23  ;;  %v297_v45 = vpop.permute.xlu0 %296 }
 0x13a   : > { %v336_v47 = vrot.slane %v297_v45, 4  ;;  %v339_v50 = vsel %vm300_vm1, %v297_v45, %v338_v41  ;;  %v355_v51 = vperm.slane %v349_v43, %v1957_v36  ;;  %v402_v60 = vrot.slane %v359_v49, 4 }
 0x13b   : > { %v347_v54 = vperm.slane %v339_v50, %v1945_v13  ;;  %v406_v1 = vrot.slane %v367_v52, 4 }
 0x13c   : > { %v337_v53 = vsel %vm300_vm1, %v336_v47, %v291_v33  ;;  %v398_v0 = vrot.slane %v355_v51, 4 }
 0x13d   : > { %v343_v56 = vperm.slane %v337_v53, %v1945_v13  ;;  %v384_v58 = vrot.slane %v347_v54, 4  ;;  %v387_v59 = vsel %vm300_vm1, %v347_v54, %v386_v48 }
 0x13e   : > { %v395_v63 = vperm.slane %v387_v59, %v1957_v36 }
 0x13f   : > { %v372_v61 = vrot.slane %v343_v56, 4  ;;  %v375_v62 = vsel %vm300_vm1, %v343_v56, %v374_v55  ;;  %v385_v3 = vsel %vm300_vm1, %v384_v58, %v335_v37 }
 0x140   : > { %v383_v2 = vperm.slane %v375_v62, %v1957_v36  ;;  %v391_v5 = vperm.slane %v385_v3, %v1957_v36  ;;  %v408_v6 = vrot.slane %v395_v63, 4  ;;  %v411_v7 = vsel %vm300_vm1, %v395_v63, %v410_v57 }
 0x141   : > { %v373_v4 = vsel %vm300_vm1, %v372_v61, %v331_v42  ;;  %v448_v11 = vrot.slane %v411_v7, 4 }
 0x142   : > { %v379_v8 = vperm.slane %v373_v4, %v1957_v36  ;;  %v400_v9 = vrot.slane %v383_v2, 4  ;;  %v403_v10 = vsel %vm300_vm1, %v383_v2, %v402_v60  ;;  %v404_v12 = vrot.slane %v391_v5, 4 }
 0x143   : > { %v407_v14 = vsel %vm300_vm1, %v391_v5, %v406_v1  ;;  %v409_v15 = vsel %vm300_vm1, %v408_v6, %v371_v46  ;;  %v424_v16 = vrot.slane %v403_v10, 4 }
 0x144   : > { %v396_v17 = vrot.slane %v379_v8, 4  ;;  %v436_v18 = vrot.slane %v409_v15, 4  ;;  %v450_v19 = vrot.slane %v407_v14, 4  ;;  %v399_v20 = vsel %vm300_vm1, %v379_v8, %v398_v0 }
 0x145   : > { %v405_v21 = vsel %vm300_vm1, %v404_v12, %v367_v52  ;;  %v401_v22 = vsel %vm300_vm1, %v400_v9, %v359_v49  ;;  %v425_v23 = vsel %vm300_vm1, %v424_v16, %v399_v20  ;;  %v426_v24 = vrot.slane %v399_v20, 4 }
 0x146   : > { %v397_v25 = vsel %vm300_vm1, %v396_v17, %v355_v51  ;;  %v412_v26 = vrot.slane %v401_v22, 4  ;;  %v431_v27 = vperm.slane %v425_v23, %v1945_v13  ;;  %v437_v28 = vsel %vm300_vm1, %v436_v18, %v405_v21 }
 0x147   : > { %v414_v29 = vrot.slane %v397_v25, 4  ;;  %v443_v30 = vperm.slane %v437_v28, %v1945_v13  ;;  %v449_v31 = vsel %vm300_vm1, %v448_v11, %v407_v14  ;;  %v427_v32 = vsel %vm300_vm1, %v403_v10, %v426_v24 }
 0x148   : > { %v413_v33 = vsel %vm300_vm1, %v412_v26, %v397_v25  ;;  %v455_v34 = vperm.slane %v449_v31, %v1945_v13  ;;  %v460_v35 = vrot.slane %v431_v27, 4  ;;  %v435_v37 = vperm.slane %v427_v32, %v1945_v13 }
 0x149   : > { %v419_v38 = vperm.slane %v413_v33, %v1945_v13  ;;  %v486_v39 = vrot.slane %v443_v30, 4  ;;  %v415_v40 = vsel %vm300_vm1, %v401_v22, %v414_v29  ;;  %v438_v41 = vrot.slane %v405_v21, 4 }
 0x14a   : > { %v484_v42 = vrot.slane %v455_v34, 4  ;;  %v423_v43 = vperm.slane %v415_v40, %v1945_v13  ;;  %v451_v44 = vsel %vm300_vm1, %v411_v7, %v450_v19  ;;  %v472_v45 = vrot.slane %v435_v37, 4 }
 0x14b   : > { %v461_v46 = vsel %vm300_vm1, %v460_v35, %v419_v38  ;;  %v462_v47 = vrot.slane %v419_v38, 4  ;;  %v487_v48 = vsel %vm300_vm1, %v455_v34, %v486_v39  ;;  %v439_v49 = vsel %vm300_vm1, %v409_v15, %v438_v41 }
 0x14c   : > { %v467_v50 = vperm.slane %v461_v46, %v1957_v36  ;;  %v485_v51 = vsel %vm300_vm1, %v484_v42, %v443_v30  ;;  %v495_v52 = vperm.slane %v487_v48, %v1957_v36  ;;  %v447_v53 = vperm.slane %v439_v49, %v1945_v13 }
 0x14d   : > { %v491_v54 = vperm.slane %v485_v51, %v1957_v36  ;;  %v463_v55 = vsel %vm300_vm1, %v431_v27, %v462_v47  ;;  %v459_v56 = vperm.slane %v451_v44, %v1945_v13  ;;  %v473_v57 = vsel %vm300_vm1, %v472_v45, %v423_v43 }
 0x14e   : > { %v471_v58 = vperm.slane %v463_v55, %v1957_v36  ;;  %v512_v59 = vrot.slane %v495_v52, 4  ;;  %v510_v60 = vrot.slane %v467_v50, 4  ;;  %v479_v1 = vperm.slane %v473_v57, %v1957_v36 }
 0x14f   : > { %v508_v61 = vrot.slane %v491_v54, 4  ;;  %v496_v62 = vrot.slane %v459_v56, 4  ;;  %v474_v4 = vrot.slane %v423_v43, 4  ;;  %v498_v5 = vrot.slane %v447_v53, 4 }
 0x150   : > { %v2015_v63 = vsel %vm300_vm1, %v512_v59, %v471_v58  ;;  %v2018_v0 = vsel %vm300_vm1, %v491_v54, %v510_v60  ;;  %v518_v7 = vrot.slane %v479_v1, 4  ;;  %v514_v9 = vrot.slane %v471_v58, 4 }
 0x151   : > { %v2022_v2 = vsel %vm300_vm1, %v508_v61, %v467_v50  ;;  %580 = vrot.lane.b32.xlu2 %v2015_v63, %s1796_s9  ;;  %553 = vrot.lane.b32.xlu1 %v2018_v0, %s1796_s9  ;;  %v497_v3 = vsel %vm300_vm1, %v496_v62, %v447_v53  ;;  %v475_v10 = vsel %vm300_vm1, %v435_v37, %v474_v4 }
 0x152   : > { %525 = vrot.lane.b32.xlu0 %v2022_v2, %s1796_s9  ;;  %v503_v6 = vperm.slane %v497_v3, %v1957_v36  ;;  %v499_v11 = vsel %vm300_vm1, %v459_v56, %v498_v5  ;;  %v483_v15 = vperm.slane %v475_v10, %v1957_v36  ;;  %v2040_v17 = vsel %vm300_vm1, %v495_v52, %v514_v9 }
 0x153   : > { %v507_v16 = vperm.slane %v499_v11, %v1957_v36  ;;  %v1568_v47 = vpack.i.bf16 %v2018_v0, %v2022_v2 }
 0x154   : > { %v516_v8 = vrot.slane %v503_v6, 4  ;;  %v2032_v12 = vsel %vm300_vm1, %v503_v6, %v518_v7  ;;  %v522_v18 = vrot.slane %v483_v15, 4 }
 0x155   : > { %v520_v19 = vrot.slane %v507_v16, 4 }
 0x156   : > { %v2035_v14 = vsel %vm300_vm1, %v516_v8, %v479_v1  ;;  %v2046_v20 = vsel %vm300_vm1, %v507_v16, %v522_v18 }
 0x157   : > { %v2049_v21 = vsel %vm300_vm1, %v520_v19, %v483_v15 }
 0x159   : > { %661 = vrot.lane.b32.xlu2 %v2032_v12, %s1796_s9  ;;  %634 = vrot.lane.b32.xlu1 %v2035_v14, %s1796_s9 }
 0x15a   : > { %607 = vrot.lane.b32.xlu0 %v2040_v17, %s1796_s9 }
 0x161   : > { %715 = vrot.lane.b32.xlu2 %v2046_v20, %s1796_s9  ;;  %688 = vrot.lane.b32.xlu1 %v2049_v21, %s1796_s9  ;;  %s247_s9 = scalar_lea.vmem [#allocation8], %s1447_s26  ;;  %s1731_s26 = scalar_lea.hbm %s2255_s4, 16 }
 0x1ab   : > { %v581_v22 = vpop.permute.xlu2 %580 }
 0x1ac   : > { %1456 = vmatpush.xpose.msk.msra.mxu3 %vm527_vm2, %v581_v22 }
 0x1af   : > { %1457 = vmatmul.msk.f32.vlgmr.msra.gmra.mxu3 %vm527_vm2, %v2015_v63 }
 0x1b3   : > { %v662_v23 = vpop.permute.xlu2 %661 }
 0x1b4   : > { %1462 = vmatpush.xpose.msk.msrb.mxu3 %vm527_vm2, %v662_v23 }
 0x1b7   : > { %1463 = vmatmul.msk.f32.vlgmr.msrb.gmra.mxu3 %vm527_vm2, %v2032_v12 }
 0x1bb   : > { %v716_v28 = vpop.permute.xlu2 %715 }
 0x1c3   : > { %v554_v24 = vpop.permute.xlu1 %553 }
 0x1c4   : > { %v526_v25 = vpop.permute.xlu0 %525  ;;  %1454 = vmatpush.xpose.msk.msra.mxu2 %vm527_vm2, %v554_v24 }
 0x1c5   : > { %1452 = vmatpush.xpose.msk.msra.mxu1 %vm527_vm2, %v526_v25 }
 0x1c7   : > { %1455 = vmatmul.msk.f32.vlgmr.msra.gmra.mxu2 %vm527_vm2, %v2018_v0 }
 0x1c8   : > { %1453 = vmatmul.msk.f32.vlgmr.msra.gmra.mxu1 %vm527_vm2, %v2022_v2 }
 0x1cb   : > { %v635_v26 = vpop.permute.xlu1 %634 }
 0x1cc   : > { %v608_v27 = vpop.permute.xlu0 %607  ;;  %1460 = vmatpush.xpose.msk.msrb.mxu2 %vm527_vm2, %v635_v26 }
 0x1cd   : > { %1458 = vmatpush.xpose.msk.msrb.mxu1 %vm527_vm2, %v608_v27 }
 0x1cf   : > { %1461 = vmatmul.msk.f32.vlgmr.msrb.gmra.mxu2 %vm527_vm2, %v2035_v14 }
 0x1d0   : > { %1459 = vmatmul.msk.f32.vlgmr.msrb.gmra.mxu1 %vm527_vm2, %v2040_v17 }
 0x1d1   : > { %1466 = vmatpush.xpose.msk.msra.mxu1 %vm527_vm2, %v716_v28 }
 0x1d3   : > { %v689_v29 = vpop.permute.xlu1 %688 }
 0x1d4   : > { %1464 = vmatpush.xpose.msk.msrb.mxu0 %vm527_vm2, %v689_v29 }
 0x1d7   : > { %1465 = vmatmul.msk.f32.vlgmr.msrb.gmra.mxu0 %vm527_vm2, %v2049_v21 }
 0x1d8   : > { %1467 = vmatmul.msk.f32.vlgmr.msra.gmra.mxu1 %vm527_vm2, %v2046_v20 }
 0x232   : > { %v603_v31 = vpop.f32.mrf.mxu3 }
 0x233   : > { %v748_v44 = vsel %vm741_vm3, %v603_v31, -inf }
 0x23a   : > { %v684_v38 = vpop.f32.mrf.mxu3 }
 0x23b   : > { %v757_v39 = vsel %vm741_vm3, %v684_v38, -inf }
 0x245   : > { %v549_v30 = vpop.f32.mrf.mxu1 }
 0x246   : > { %v742_v32 = vsel %vm741_vm3, %v549_v30, -inf }
 0x247   : > { %743 = vmax.xlane.f32.xlu0 %v742_v32 }
 0x24a   : > { %v576_v33 = vpop.f32.mrf.mxu2 }
 0x24b   : > { %v745_v34 = vsel %vm741_vm3, %v576_v33, -inf }
 0x24c   : > { %746 = vmax.xlane.f32.xlu1 %v745_v34  ;;  %v1578_v34 = vpack.i.bf16 %v2032_v12, %v2040_v17 }
 0x24d   : > { %v630_v35 = vpop.f32.mrf.mxu1 }
 0x24e   : > { %v751_v37 = vsel %vm741_vm3, %v630_v35, -inf }
 0x24f   : > { %752 = vmax.xlane.f32.xlu0 %v751_v37  ;;  %v1573_v37 = vpack.i.bf16 %v2035_v14, %v2015_v63 }
 0x252   : > { %v657_v45 = vpop.f32.mrf.mxu2 }
 0x253   : > { %v754_v46 = vsel %vm741_vm3, %v657_v45, -inf }
 0x254   : > { %758 = vmax.xlane.f32.xlu1 %v757_v39  ;;  %v711_v40 = vpop.f32.mrf.mxu0 }
 0x255   : > { %v738_v41 = vpop.f32.mrf.mxu1  ;;  %v760_v42 = vsel %vm741_vm3, %v711_v40, -inf }
 0x256   : > { %v763_v43 = vsel %vm741_vm3, %v738_v41, -inf  ;;  %761 = vmax.xlane.f32.xlu2 %v760_v42 }
 0x257   : > { %764 = vmax.xlane.f32.xlu0 %v763_v43 }
 0x25e   : > { %749 = vmax.xlane.f32.xlu2 %v748_v44 }
 0x266   : > { %755 = vmax.xlane.f32.xlu2 %v754_v46 }
 0x26b   : > { %1569 = vrot.lane.b32.xlu0 %v1568_v47, %s1797_s10 }
 0x2ba   : > { %v744_v48 = vpop.xlane.xlu0 %743 }
 0x2bb   : > { %v766_v49 = vsub.f32 %v549_v30, %v744_v48 }
 0x2bd   : > { %v774_v50 = vmul.f32 1.442695, %v766_v49 }
 0x2bf   : > { %1589 = vpow2.f32 %v774_v50  ;;  %v747_v53 = vpop.xlane.xlu1 %746 }
 0x2c0   : > { %v767_v57 = vsub.f32 %v576_v33, %v747_v53 }
 0x2c2   : > { %v753_v56 = vpop.xlane.xlu0 %752  ;;  %v776_v59 = vmul.f32 1.442695, %v767_v57 }
 0x2c3   : > { %v769_v0 = vsub.f32 %v630_v35, %v753_v56  ;;  %v1583_v35 = vpack.i.bf16 %v2046_v20, %v2049_v21 }
 0x2c5   : > { %v2088_v51 = vpop.eup %1589  ;;  %v780_v4 = vmul.f32 1.442695, %v769_v0 }
 0x2c6   : > { %v790_v52 = vsel %vm741_vm3, %v2088_v51, 0.0 }
 0x2c7   : > { %791 = vadd.xlane.f32.xlu1 %v790_v52  ;;  %v759_v5 = vpop.xlane.xlu1 %758 }
 0x2c8   : > { %v771_v9 = vsub.f32 %v684_v38, %v759_v5 }
 0x2c9   : > { %v762_v54 = vpop.xlane.xlu2 %761 }
 0x2ca   : > { %v772_v55 = vsub.f32 %v711_v40, %v762_v54  ;;  %v765_v2 = vpop.xlane.xlu0 %764  ;;  %v784_v24 = vmul.f32 1.442695, %v771_v9 }
 0x2cb   : > { %v773_v11 = vsub.f32 %v738_v41, %v765_v2 }
 0x2cc   : > { %v786_v58 = vmul.f32 1.442695, %v772_v55 }
 0x2cd   : > { %v788_v25 = vmul.f32 1.442695, %v773_v11 }
 0x2ce   : > { %1591 = vpow2.f32 %v786_v58 }
 0x2cf   : > { %1593 = vpow2.f32 %v776_v59 }
 0x2d1   : > { %v750_v60 = vpop.xlane.xlu2 %749 }
 0x2d2   : > { %v768_v61 = vsub.f32 %v603_v31, %v750_v60 }
 0x2d4   : > { %v2092_v62 = vpop.eup %1591  ;;  %v778_v1 = vmul.f32 1.442695, %v768_v61 }
 0x2d5   : > { %v808_v3 = vsel %vm741_vm3, %v2092_v62, 0.0  ;;  %v1594_v7 = vpop.eup %1593 }
 0x2d6   : > { %1595 = vpow2.f32 %v778_v1  ;;  %809 = vadd.xlane.f32.xlu2 %v808_v3  ;;  %v793_v18 = vsel %vm741_vm3, %v1594_v7, 0.0 }
 0x2d7   : > { %1597 = vpow2.f32 %v780_v4 }
 0x2d9   : > { %v756_v6 = vpop.xlane.xlu2 %755 }
 0x2da   : > { %v770_v8 = vsub.f32 %v657_v45, %v756_v6 }
 0x2dc   : > { %v2096_v10 = vpop.eup %1595  ;;  %v782_v15 = vmul.f32 1.442695, %v770_v8 }
 0x2dd   : > { %v1570_v16 = vpop.permute.xlu0 %1569  ;;  %v796_v19 = vsel %vm741_vm3, %v2096_v10, 0.0  ;;  %v1598_v26 = vpop.eup %1597 }
 0x2de   : > { %1599 = vpow2.f32 %v782_v15  ;;  %v1572_v22 = vunpack.i.h.bf16 %v1570_v16  ;;  %v1571_v23 = vunpack.i.l.bf16 %v1570_v16  ;;  %794 = vadd.xlane.f32.xlu2 %v793_v18  ;;  %797 = vadd.xlane.f32.xlu0 %v796_v19  ;;  %v799_v29 = vsel %vm741_vm3, %v1598_v26, 0.0 }
 0x2df   : > { %1601 = vpow2.f32 %v784_v24 }
 0x2e0   : > { %851 = vmatpush.msra.mxu2 %v1571_v23  ;;  %877 = vmatpush.msra.mxu3 %v1572_v22  ;;  %1603 = vpow2.f32 %v788_v25 }
 0x2e4   : > { %v2101_v27 = vpop.eup %1599 }
 0x2e5   : > { %v802_v28 = vsel %vm741_vm3, %v2101_v27, 0.0  ;;  %v1602_v30 = vpop.eup %1601 }
 0x2e6   : > { %803 = vadd.xlane.f32.xlu1 %v802_v28  ;;  %800 = vadd.xlane.f32.xlu2 %v799_v29  ;;  %v1604_v31 = vpop.eup %1603  ;;  %v805_v32 = vsel %vm741_vm3, %v1602_v30, 0.0 }
 0x2e7   : > { %v811_v33 = vsel %vm741_vm3, %v1604_v31, 0.0 }
 0x2ee   : > { %806 = vadd.xlane.f32.xlu1 %v805_v32  ;;  %812 = vadd.xlane.f32.xlu2 %v811_v33 }
 0x2f2   : > { %1579 = vrot.lane.b32.xlu0 %v1578_v34, %s1797_s10 }
 0x306   : > { %1584 = vrot.lane.b32.xlu2 %v1583_v35, %s1797_s10 }
 0x307   : > { %1574 = vrot.lane.b32.xlu1 %v1573_v37, %s1797_s10  ;;  %s1347_s10 = sshll.u32 %s247_s9, 4  ;;  %s1348_s10 = int_to_ptr.vmem [resolvable:$true] %s1347_s10 }
 0x33a   : > { %v792_v38 = vpop.xlane.xlu1 %791 }
 0x33b   : > { %1605 = vrcp.f32 %v792_v38 }
 0x341   : > { %v1606_v39 = vpop.eup %1605 }
 0x342   : > { %v822_v40 = vmul.f32 %v1606_v39, %v2088_v51 }
 0x344   : > { %1468 = vmatmul.msk.f32.vlgmr.msra.gmra.mxu2 %vm741_vm3, %v822_v40 }
 0x349   : > { %v810_v12 = vpop.xlane.xlu2 %809 }
 0x351   : > { %v795_v17 = vpop.xlane.xlu2 %794  ;;  %v798_v63 = vpop.xlane.xlu0 %797 }
 0x352   : > { %1607 = vrcp.f32 %v795_v17 }
 0x358   : > { %v1608_v41 = vpop.eup %1607 }
 0x359   : > { %v823_v42 = vmul.f32 %v1608_v41, %v1594_v7  ;;  %v804_v20 = vpop.xlane.xlu1 %803  ;;  %v801_v21 = vpop.xlane.xlu2 %800 }
 0x35a   : > { %1609 = vrcp.f32 %v801_v21 }
 0x35b   : > { %1469 = vmatmul.msk.f32.vlgmr.msra.gmra.mxu3 %vm741_vm3, %v823_v42 }
 0x360   : > { %v1610_v44 = vpop.eup %1609 }
 0x361   : > { %v807_v14 = vpop.xlane.xlu1 %806  ;;  %v813_v43 = vpop.xlane.xlu2 %812  ;;  %v825_v48 = vmul.f32 %v1610_v44, %v1598_v26 }
 0x362   : > { %1611 = vrcp.f32 %v807_v14 }
 0x363   : > { %1613 = vrcp.f32 %v813_v43 }
 0x364   : > { %v1580_v45 = vpop.permute.xlu0 %1579  ;;  %1615 = vrcp.f32 %v798_v63 }
 0x365   : > { %v1582_v46 = vunpack.i.h.bf16 %v1580_v45  ;;  %v1581_v47 = vunpack.i.l.bf16 %v1580_v45  ;;  %1617 = vrcp.f32 %v804_v20 }
 0x366   : > { %1619 = vrcp.f32 %v810_v12 }
 0x367   : > { %929 = vmatpush.msrb.mxu1 %v1581_v47  ;;  %981 = vmatpush.msrb.mxu3 %v1582_v46 }
 0x368   : > { %v1612_v49 = vpop.eup %1611  ;;  %1471 = vmatmul.msk.f32.vlgmr.msrb.gmra.mxu1 %vm741_vm3, %v825_v48 }
 0x369   : > { %v827_v50 = vmul.f32 %v1612_v49, %v1602_v30  ;;  %v1585_v51 = vpop.permute.xlu2 %1584  ;;  %v1614_v53 = vpop.eup %1613 }
 0x36a   : > { %v1587_v52 = vunpack.i.h.bf16 %v1585_v51  ;;  %v829_v54 = vmul.f32 %v1614_v53, %v1604_v31  ;;  %v1616_v55 = vpop.eup %1615  ;;  %v1586_v0 = vunpack.i.l.bf16 %v1585_v51 }
 0x36b   : > { %1473 = vmatmul.msk.f32.vlgmr.msrb.gmra.mxu3 %vm741_vm3, %v827_v50  ;;  %v1618_v56 = vpop.eup %1617  ;;  %v824_v60 = vmul.f32 %v1616_v55, %v2096_v10 }
 0x36c   : > { %1033 = vmatpush.msra.mxu1 %v1587_v52  ;;  %v826_v61 = vmul.f32 %v1618_v56, %v2101_v27  ;;  %v1620_v1 = vpop.eup %1619 }
 0x36d   : > { %v828_v2 = vmul.f32 %v1620_v1, %v2092_v62 }
 0x370   : > { %1475 = vmatmul.msk.f32.vlgmr.msra.gmra.mxu1 %vm741_vm3, %v829_v54 }
 0x379   : > { %v1575_v57 = vpop.permute.xlu1 %1574 }
 0x37a   : > { %v1577_v58 = vunpack.i.h.bf16 %v1575_v57  ;;  %v1576_v59 = vunpack.i.l.bf16 %v1575_v57 }
 0x37c   : > { %903 = vmatpush.msra.mxu0 %v1576_v59  ;;  %955 = vmatpush.msrb.mxu2 %v1577_v58 }
 0x37d   : > { %1470 = vmatmul.msk.f32.vlgmr.msra.gmra.mxu0 %vm741_vm3, %v824_v60  ;;  %1472 = vmatmul.msk.f32.vlgmr.msrb.gmra.mxu2 %vm741_vm3, %v826_v61 }
 0x37e   : > { %1007 = vmatpush.msrb.mxu0 %v1586_v0 }
 0x385   : > { %1474 = vmatmul.msk.f32.vlgmr.msrb.gmra.mxu0 %vm741_vm3, %v828_v2 }
 0x3c7   : > { %v853_v7 = vpop.f32.mrf.mxu2 }
 0x3c8   : > { %v1040_v15 = vrot.slane %v853_v7, 4 }
 0x3de   : > { %v879_v3 = vpop.f32.mrf.mxu3 }
 0x3df   : > { %v1052_v6 = vrot.slane %v879_v3, 4 }
 0x3e5   : > { %v931_v4 = vpop.f32.mrf.mxu1 }
 0x3e6   : > { %v1050_v5 = vrot.slane %v931_v4, 4  ;;  %v1053_v9 = vsel %vm300_vm1, %v931_v4, %v1052_v6 }
 0x3e7   : > { %v1061_v18 = vperm.slane %v1053_v9, %v1945_v13 }
 0x3e8   : > { %v1051_v10 = vsel %vm300_vm1, %v1050_v5, %v879_v3 }
 0x3e9   : > { %v1057_v62 = vperm.slane %v1051_v10, %v1945_v13  ;;  %v1098_v28 = vrot.slane %v1061_v18, 4 }
 0x3eb   : > { %v1086_v31 = vrot.slane %v1057_v62, 4 }
 0x3ed   : > { %v1035_v11 = vpop.f32.mrf.mxu1 }
 0x3ee   : > { %v983_v8 = vpop.f32.mrf.mxu3  ;;  %v1074_v22 = vrot.slane %v1035_v11, 4 }
 0x3ef   : > { %v1076_v16 = vrot.slane %v983_v8, 4 }
 0x3f0   : > { %v1075_v32 = vsel %vm300_vm1, %v1074_v22, %v983_v8 }
 0x3f1   : > { %v1077_v26 = vsel %vm300_vm1, %v1035_v11, %v1076_v16  ;;  %v1081_v40 = vperm.slane %v1075_v32, %v1945_v13 }
 0x3f2   : > { %v1085_v33 = vperm.slane %v1077_v26, %v1945_v13 }
 0x3f3   : > { %v1110_v47 = vrot.slane %v1081_v40, 4 }
 0x3f4   : > { %v1122_v21 = vrot.slane %v1085_v33, 4 }
 0x3fa   : > { %v905_v19 = vpop.f32.mrf.mxu0 }
 0x3fb   : > { %v1038_v23 = vrot.slane %v905_v19, 4  ;;  %v1041_v24 = vsel %vm300_vm1, %v905_v19, %v1040_v15 }
 0x3fc   : > { %v1049_v25 = vperm.slane %v1041_v24, %v1945_v13 }
 0x3fd   : > { %v1039_v27 = vsel %vm300_vm1, %v1038_v23, %v853_v7 }
 0x3fe   : > { %v1045_v29 = vperm.slane %v1039_v27, %v1945_v13  ;;  %v1100_v30 = vrot.slane %v1049_v25, 4  ;;  %v1099_v35 = vsel %vm300_vm1, %v1098_v28, %v1049_v25 }
 0x3ff   : > { %v1105_v42 = vperm.slane %v1099_v35, %v1957_v36 }
 0x400   : > { %v1088_v34 = vrot.slane %v1045_v29, 4  ;;  %v957_v37 = vpop.f32.mrf.mxu2  ;;  %v1087_v38 = vsel %vm300_vm1, %v1086_v31, %v1045_v29  ;;  %v1101_v17 = vsel %vm300_vm1, %v1061_v18, %v1100_v30 }
 0x401   : > { %v1064_v39 = vrot.slane %v957_v37, 4  ;;  %v1093_v63 = vperm.slane %v1087_v38, %v1957_v36  ;;  %v1109_v44 = vperm.slane %v1101_v17, %v1957_v36  ;;  %v1144_v49 = vrot.slane %v1105_v42, 4 }
 0x402   : > { %v1089_v12 = vsel %vm300_vm1, %v1057_v62, %v1088_v34  ;;  %v1009_v41 = vpop.f32.mrf.mxu0 }
 0x403   : > { %v1062_v20 = vrot.slane %v1009_v41, 4  ;;  %v1065_v14 = vsel %vm300_vm1, %v1009_v41, %v1064_v39  ;;  %v1097_v43 = vperm.slane %v1089_v12, %v1957_v36  ;;  %v1136_v52 = vrot.slane %v1093_v63, 4 }
 0x404   : > { %v1073_v46 = vperm.slane %v1065_v14, %v1945_v13  ;;  %v1148_v57 = vrot.slane %v1109_v44, 4 }
 0x405   : > { %v1063_v45 = vsel %vm300_vm1, %v1062_v20, %v957_v37  ;;  %v1140_v56 = vrot.slane %v1097_v43, 4 }
 0x406   : > { %v1069_v48 = vperm.slane %v1063_v45, %v1945_v13  ;;  %v1123_v50 = vsel %vm300_vm1, %v1122_v21, %v1073_v46  ;;  %v1124_v51 = vrot.slane %v1073_v46, 4 }
 0x407   : > { %v1129_v55 = vperm.slane %v1123_v50, %v1957_v36 }
 0x408   : > { %v1111_v53 = vsel %vm300_vm1, %v1110_v47, %v1069_v48  ;;  %v1112_v54 = vrot.slane %v1069_v48, 4  ;;  %v1125_v59 = vsel %vm300_vm1, %v1085_v33, %v1124_v51 }
 0x409   : > { %v1117_v58 = vperm.slane %v1111_v53, %v1957_v36  ;;  %v1133_v61 = vperm.slane %v1125_v59, %v1957_v36  ;;  %v1142_v0 = vrot.slane %v1129_v55, 4  ;;  %v1145_v1 = vsel %vm300_vm1, %v1129_v55, %v1144_v49 }
 0x40a   : > { %v1113_v60 = vsel %vm300_vm1, %v1081_v40, %v1112_v54  ;;  %v1188_v5 = vrot.slane %v1145_v1, 4 }
 0x40b   : > { %v1121_v2 = vperm.slane %v1113_v60, %v1957_v36  ;;  %v1134_v3 = vrot.slane %v1117_v58, 4  ;;  %v1137_v4 = vsel %vm300_vm1, %v1117_v58, %v1136_v52  ;;  %v1143_v6 = vsel %vm300_vm1, %v1142_v0, %v1105_v42 }
 0x40c   : > { %v1146_v7 = vrot.slane %v1133_v61, 4  ;;  %v1149_v8 = vsel %vm300_vm1, %v1133_v61, %v1148_v57  ;;  %v1164_v9 = vrot.slane %v1137_v4, 4  ;;  %v1176_v15 = vrot.slane %v1143_v6, 4 }
 0x40d   : > { %v1135_v10 = vsel %vm300_vm1, %v1134_v3, %v1093_v63  ;;  %v1138_v11 = vrot.slane %v1121_v2, 4  ;;  %v1186_v16 = vrot.slane %v1149_v8, 4  ;;  %v1141_v19 = vsel %vm300_vm1, %v1121_v2, %v1140_v56 }
 0x40e   : > { %v1147_v18 = vsel %vm300_vm1, %v1146_v7, %v1109_v44  ;;  %v1152_v62 = vrot.slane %v1135_v10, 4  ;;  %v1189_v22 = vsel %vm300_vm1, %v1149_v8, %v1188_v5  ;;  %v1162_v24 = vrot.slane %v1141_v19, 4 }
 0x40f   : > { %v1139_v23 = vsel %vm300_vm1, %v1138_v11, %v1097_v43  ;;  %v1165_v25 = vsel %vm300_vm1, %v1141_v19, %v1164_v9  ;;  %v1177_v26 = vsel %vm300_vm1, %v1147_v18, %v1176_v15  ;;  %v1197_v32 = vperm.slane %v1189_v22, %v1945_v13  ;;  %v1303_v19 = vld [vmem:[#allocation7 + $0x8] sm:$0xff] }
 0x410   : > { %v1150_v27 = vrot.slane %v1139_v23, 4  ;;  %v1153_v28 = vsel %vm300_vm1, %v1139_v23, %v1152_v62  ;;  %v1173_v29 = vperm.slane %v1165_v25, %v1945_v13  ;;  %v1185_v30 = vperm.slane %v1177_v26, %v1945_v13  ;;  %v1302_v62 = vld [vmem:[#allocation7] sm:$0xff] }
 0x411   : > { %v1161_v31 = vperm.slane %v1153_v28, %v1945_v13  ;;  %v1163_v33 = vsel %vm300_vm1, %v1162_v24, %v1137_v4  ;;  %v1174_v34 = vrot.slane %v1147_v18, 4  ;;  %v1234_v40 = vrot.slane %v1197_v32, 4  ;;  %v1304_v18 = vld [vmem:[#allocation7 + $0x10] sm:$0xff] }
 0x412   : > { %v1210_v35 = vrot.slane %v1173_v29, 4  ;;  %v1236_v37 = vrot.slane %v1185_v30, 4  ;;  %v1151_v38 = vsel %vm300_vm1, %v1150_v27, %v1135_v10  ;;  %v1169_v39 = vperm.slane %v1163_v33, %v1945_v13 }
 0x413   : > { %v1212_v12 = vrot.slane %v1161_v31, 4  ;;  %v1157_v17 = vperm.slane %v1151_v38, %v1945_v13  ;;  %v1175_v41 = vsel %vm300_vm1, %v1174_v34, %v1143_v6  ;;  %v1187_v63 = vsel %vm300_vm1, %v1186_v16, %v1145_v1  ;;  %v1305_v16 = vld [vmem:[#allocation7 + $0x18] sm:$0xff] }
 0x414   : > { %v1211_v42 = vsel %vm300_vm1, %v1210_v35, %v1161_v31  ;;  %v1237_v20 = vsel %vm300_vm1, %v1197_v32, %v1236_v37  ;;  %v1181_v21 = vperm.slane %v1175_v41, %v1945_v13  ;;  %v1235_v43 = vsel %vm300_vm1, %v1234_v40, %v1185_v30  ;;  %1325 = vmatpush.msra.mxu2 %v1305_v16  ;;  %v1588_v37 = vld [vmem:[%s2254_s3] ss:$0 sm:$0xff] }
 0x415   : > { %v1217_v14 = vperm.slane %v1211_v42, %v1957_v36  ;;  %v1213_v44 = vsel %vm300_vm1, %v1173_v29, %v1212_v12  ;;  %v1245_v45 = vperm.slane %v1237_v20, %v1957_v36  ;;  %v1241_v46 = vperm.slane %v1235_v43, %v1957_v36 }
 0x416   : > { %v1221_v47 = vperm.slane %v1213_v44, %v1957_v36  ;;  %v1193_v48 = vperm.slane %v1187_v63, %v1945_v13  ;;  %v1198_v49 = vrot.slane %v1169_v39, 4  ;;  %v1200_v51 = vrot.slane %v1157_v17, 4  ;;  %1326 = vmatpush.msra.mxu2 %v1304_v18 }
 0x417   : > { %v1258_v50 = vrot.slane %v1245_v45, 4  ;;  %v1224_v52 = vrot.slane %v1181_v21, 4  ;;  %v1254_v53 = vrot.slane %v1241_v46, 4  ;;  %v1256_v11 = vrot.slane %v1217_v14, 4 }
 0x418   : > { %v1199_v54 = vsel %vm300_vm1, %v1198_v49, %v1157_v17  ;;  %v1222_v55 = vrot.slane %v1193_v48, 4  ;;  %v1201_v60 = vsel %vm300_vm1, %v1169_v39, %v1200_v51  ;;  %v1260_v10 = vrot.slane %v1221_v47, 4  ;;  %1327 = vmatpush.msra.mxu2 %v1303_v19 }
 0x419   : > { %v1259_v56 = vsel %vm300_vm1, %v1258_v50, %v1221_v47  ;;  %v1205_v57 = vperm.slane %v1199_v54, %v1957_v36  ;;  %v1225_v58 = vsel %vm300_vm1, %v1193_v48, %v1224_v52  ;;  %v1255_v59 = vsel %vm300_vm1, %v1254_v53, %v1217_v14 }
 0x41a   : > { %1283 = vrot.lane.b32.xlu2 %v1259_v56, %s1798_s21  ;;  %v1223_v13 = vsel %vm300_vm1, %v1222_v55, %v1181_v21  ;;  %v1233_v61 = vperm.slane %v1225_v58, %v1957_v36  ;;  %1275 = vrot.lane.b32.xlu1 %v1255_v59, %s1799_s24  ;;  %v1209_v4 = vperm.slane %v1201_v60, %v1957_v36  ;;  %s1349_s21 = sshll.u32 %s1345_s5, 4  ;;  %s1350_s21 = int_to_ptr.hbm [resolvable:$true] %s1349_s21 }
 0x41b   : > { %v1229_v0 = vperm.slane %v1223_v13, %v1957_v36  ;;  %v1248_v1 = vrot.slane %v1205_v57, 4  ;;  %v1261_v15 = vsel %vm300_vm1, %v1245_v45, %v1260_v10  ;;  %v1257_v36 = vsel %vm300_vm1, %v1241_v46, %v1256_v11  ;;  %1328 = vmatpush.msra.mxu2 %v1302_v62  ;;  %s1725_s24 = sshra.s32 %s1350_s21, 4  ;;  %s1726_s24 = int_to_ptr.hbm [resolvable:$true] %s1725_s24 }
 0x41c   : > { %v1250_v5 = vrot.slane %v1233_v61, 4  ;;  %v1252_v7 = vrot.slane %v1209_v4, 4  ;;  %p1732_p12 = scmp.lt.s32.totalorder %s1726_s24, %s2255_s4 }
 0x41d   : > { %v1246_v2 = vrot.slane %v1229_v0, 4  ;;  %v1249_v3 = vsel %vm300_vm1, %v1229_v0, %v1248_v1 }
 0x41e   : > { %1263 = vrot.lane.b32.xlu0 %v1249_v3, %s1800_s25  ;;  %v1251_v8 = vsel %vm300_vm1, %v1250_v5, %v1209_v4  ;;  %v1253_v9 = vsel %vm300_vm1, %v1233_v61, %v1252_v7  ;;  %s1727_s25 = scalar_lea.hbm %s1726_s24, 8 }
 0x41f   : > { %v1247_v6 = vsel %vm300_vm1, %v1246_v2, %v1205_v57  ;;  %p1728_p1 = scmp.ne.s32.totalorder %s1726_s24, %s1727_s25  ;;  %p1733_p7 = scmp.lt.s32.totalorder %s1731_s26, %s1727_s25 }
 0x421   : > { %p1729_p3 = pnand %p1728_p1, %p1899_p4  ;;  %p1734_p8 = por %p1733_p7, %p1732_p12 }
 0x422   : > { %1267 = vrot.lane.b32.xlu1 %v1251_v8, %s1801_s12 }
 0x423   : > { %p1730_p5 = pneg %p1729_p3 }
 0x425   : > { %p1735_p9 = pnand %p1734_p8, %p1730_p5 }
 0x426   : > { %1271 = vrot.lane.b32.xlu0 %v1253_v9, %s1802_s27 }
 0x42a   : > { %1287 = vrot.lane.b32.xlu1 %v1261_v15, %s1803_s28 }
 0x42e   : > { %1279 = vrot.lane.b32.xlu0 %v1257_v36, %s1804_s23 }
 0x474   : > { %v1284_v31 = vpop.permute.xlu2 %1283 }
 0x48c   : > { %v1276_v22 = vpop.permute.xlu1 %1275 }
 0x490   : > { %v1264_v23 = vpop.permute.xlu0 %1263 }
 0x491   : > { %v1290_v26 = vsel %vm527_vm2, %v1247_v6, %v1264_v23 }
 0x494   : > { %v1268_v24 = vpop.permute.xlu1 %1267 }
 0x495   : > { %v1291_v27 = vsel %vm741_vm3, %v1290_v26, %v1268_v24 }
 0x498   : > { %v1272_v25 = vpop.permute.xlu0 %1271 }
 0x499   : > { %v1293_v28 = vsel %vm1292_vm4, %v1291_v27, %v1272_v25 }
 0x49a   : > { %v1295_v30 = vsel %vm1294_vm5, %v1293_v28, %v1276_v22 }
 0x49c   : > { %v1288_v33 = vpop.permute.xlu1 %1287 }
 0x4a0   : > { %v1280_v29 = vpop.permute.xlu0 %1279 }
 0x4a1   : > { %v1297_v32 = vsel %vm1296_vm6, %v1295_v30, %v1280_v29 }
 0x4a2   : > { %v1299_v34 = vsel %vm1298_vm7, %v1297_v32, %v1284_v31 }
 0x4a3   : > { %v1301_v35 = vsel %vm1300_vm8, %v1299_v34, %v1288_v33 }
 0x4a4   : > { %1476 = vmatmul.msk.f32.vlgmr.msra.gmra.mxu2 %vm253_vm0, %v1301_v35 }
 0x527   : > { %v1330_v38 = vpop.f32.mrf.mxu2 }
 0x528   : > { %v1331_v39 = vadd.f32 %v1588_v37, %v1330_v38 }
 0x52a   : > { %1333 = vst.msk [vmem:[%s247_s9] sm:$0xff] %vm253_vm0, %v1331_v39 }
 0x52b   : > { %1738 = shalt.err (!%p1735_p9)
}
 0x52c   : > { %1491 = dma.vmem_to_hbm [thread:$0]  (%p1899_p4), %s1348_s10, 128, %s1350_s21, %s1335_s22  }
 0x52d PF: > { %s1361_s14 = sand.u32 1, %s1769_s15   ;;  %p2262_p10 = scmp.ge.s32.totalorder %s1781_s18, 2 }
 0x52e   : > { %s1362_s13 = scalar_lea.sflag [#allocation4], %s1361_s14 }
 0x52f   : > { %p1505_p13 = pnand %p2262_p10, %p1903_p6 }
 0x531   : > { %p1506_p11 = pneg %p1505_p13 }
 0x533   : > { %1764 = dma.done.wait (%p1506_p11), %s1362_s13, 128  }
 0x534   : > { %1766 = vsyncadd (%p1506_p11), %s1362_s13, 4294967168  ;;  %p18_p0 = scmp.ge.s32.totalorder %s1873_s8, 4   ;;  %s2263_s15 = smov %s1773_s16 }
 0x535   : > { %s2264_s16 = smov %s1777_s17  ;;  %s2265_s17 = smov %s1884_s11 }
 0x536   : > { %s2266_s18 = smov %s1873_s8  ;;  %20 = sbr.rel (!%p18_p0) target bundleno = 6 (0x6), region = 89 }
 0x53b   :  { %1368 = vsyncpa [#allocation3], 1 }
 0x53c   :  { %1370 = vsyncpa [#allocation3 + $0x1], 1 }
 0x53d   :  { %1371 = vsyncpa [#allocation6], 1 }
 0x53e   :  { %1372 = vsyncpa [#allocation4], 1 }
 0x53f   :  { %1374 = vsyncpa [#allocation4 + $0x1], 1 }

</bundles_post_ra>
